<compile_context>
chip_gen: v5e
topology: v5e:2x2
jax: 0.10.0
libtpu: 0.0.40
codegen_flags: <defaults>
</compile_context>

<pallas_src>
import jax
import jax.numpy as jnp
from jax.experimental import pallas as pl
from jax.experimental.pallas import tpu as pltpu


def _identity_kernel(x_ref, o_ref):
    # Whole-tile elementwise pass-through.
    o_ref[...] = x_ref[...]


# Per-tile VMEM budget for the pipelined path (in + out, double-buffered
# => ~4x this resident in VMEM).
_TILE_BYTES = 2 * 1024 * 1024


def identity(x: jax.Array) -> jax.Array:
    """Identity forward pass: returns x unchanged (via a Pallas copy kernel)."""
    orig_shape = x.shape
    dtype = x.dtype
    total = int(x.size)
    if total == 0:
        return x

    itemsize = jnp.dtype(dtype).itemsize
    cost = pl.CostEstimate(
        flops=0, transcendentals=0, bytes_accessed=2 * total * itemsize
    )

    # Lane-dense flatten: last dim a large multiple of 128 (free metadata
    # reshape for contiguous NCHW).
    lane_width = next((c for c in (1024, 512, 256, 128) if total % c == 0), None)
    if lane_width is not None:
        rows = total // lane_width
        x2d = x.reshape(rows, lane_width)
    else:
        # TODO(synk): sizes not divisible by 128 fall back to an untiled
        # whole-array block; fine for small activations, not tiled for huge ones.
        x2d = x.reshape(-1, orig_shape[-1]) if x.ndim >= 2 else x.reshape(1, -1)
        rows, lane_width = x2d.shape

    small = total * itemsize <= 2 * _TILE_BYTES
    if small or (lane_width % 128 != 0):
        # Single untiled VMEM block — no grid loop, minimal overhead.
        out2d = pl.pallas_call(
            _identity_kernel,
            out_shape=jax.ShapeDtypeStruct(x2d.shape, dtype),
            in_specs=[pl.BlockSpec(memory_space=pltpu.MemorySpace.VMEM)],
            out_specs=pl.BlockSpec(memory_space=pltpu.MemorySpace.VMEM),
            input_output_aliases={0: 0},
            cost_estimate=cost,
        )(x2d)
    else:
        # Tiled, software-pipelined copy.
        row_bytes = lane_width * itemsize
        block_rows = max(8, (_TILE_BYTES // row_bytes) // 8 * 8)  # multiple of 8
        block_rows = min(block_rows, rows)
        grid = (pl.cdiv(rows, block_rows),)
        out2d = pl.pallas_call(
            _identity_kernel,
            out_shape=jax.ShapeDtypeStruct((rows, lane_width), dtype),
            grid=grid,
            in_specs=[pl.BlockSpec((block_rows, lane_width), lambda i: (i, 0))],
            out_specs=pl.BlockSpec((block_rows, lane_width), lambda i: (i, 0)),
            input_output_aliases={0: 0},
            cost_estimate=cost,
            compiler_params=pltpu.CompilerParams(
                dimension_semantics=("parallel",),
            ),
        )(x2d)

    return out2d.reshape(orig_shape)


if __name__ == "__main__":
    key = jax.random.PRNGKey(0)

    # NCHW input consistent with DARTS ops: batch=2, channels=4, spatial=16x16.
    x = jax.random.normal(key, (2, 4, 16, 16), dtype=jnp.float32)
    y = identity(x)
    jax.block_until_ready(y)
    assert y.shape == x.shape
    assert y.dtype == x.dtype
    assert bool(jnp.all(y == x))

    # Exercise the tiled (pipelined, lane-dense) path as well.
    x_big = jax.random.normal(key, (8, 16, 32, 64), dtype=jnp.float32)  # 1 MiB*4 > 4 MiB? -> 8*16*32*64*4 = 4 MiB... use bigger
    x_big = jax.random.normal(key, (8, 32, 32, 64), dtype=jnp.float32)  # 8 MiB -> tiled path
    y_big = identity(x_big)
    jax.block_until_ready(y_big)
    assert y_big.shape == x_big.shape
    assert bool(jnp.all(y_big == x_big))

    print("KERNEL_OK")
</pallas_src>

<mosaic_0001>
module attributes {stable_mosaic.version = 11 : i64} {
  func.func @_identity_kernel(%arg0: memref<2x1024xf32, #tpu.memory_space<vmem>>, %arg1: memref<2x1024xf32, #tpu.memory_space<vmem>>) attributes {dimension_semantics = [], scalar_prefetch = 0 : i64, scratch_operands = 0 : i64, tpu.core_type = #tpu.core_type<tc>} {
    %c0 = arith.constant 0 : index
    %c0_0 = arith.constant 0 : index
    %0 = vector.load %arg0[%c0, %c0_0] : memref<2x1024xf32, #tpu.memory_space<vmem>>, vector<2x1024xf32>
    %c0_1 = arith.constant 0 : index
    %c0_2 = arith.constant 0 : index
    %1 = vector.load %arg1[%c0_1, %c0_2] : memref<2x1024xf32, #tpu.memory_space<vmem>>, vector<2x1024xf32>
    tpu.vector_store %arg1[%c0_1, %c0_2], %0 {strides = array<i32>} : memref<2x1024xf32, #tpu.memory_space<vmem>>, vector<2x1024xf32>,
    return
  }
}

</mosaic_0001>

<bundles_post_ra>
// kernel: tpu_custom_call.1
= control target key start
LH: loop header
LB: loop body
LE: loop exit
PB: predicated region body
PF: predicated region fallthrough
CT: control target
= control target key end

     0   :  { %6 = vsyncpa [#allocation3], 0  ;;  %s116_s0 = inlined_call_operand.hbm [shape: f32[2,1024], index: 0, kind: input, shape index: {}, may-alias: {0,1}]   ;;  %s117_s1 = inlined_call_operand.hbm [shape: f32[2,1024], index: 1, kind: output, shape index: {}, may-alias: {0,1}]  }
   0x1   :  { %7 = vsyncpa [#allocation4], 0  ;;  %s13_s8 = sshll.u32 %s116_s0, 4  ;;  %s98_s9 = smov [#allocation2]   ;;  %s14_s8 = int_to_ptr.hbm [resolvable:$true] %s13_s8 }
   0x2   :  { %s15_s10 = sshll.u32 %s98_s9, 4  ;;  %s16_s10 = int_to_ptr.vmem [resolvable:$true] %s15_s10 }
   0x3   :  { %18 = dma.hbm_to_vmem [thread:$0]  %s14_s8, 256, %s16_s10, [#allocation3]  }
   0x4   :  { %94 = dma.done.wait [#allocation3], 256  }
   0x5   :  { %95 = vsyncadd [#allocation3], 4294967040  ;;  %s99_s11 = smov [#allocation5]   ;;  %s34_s15 = sshll.u32 %s117_s1, 4  ;;  %v23_v0 = vld [vmem:[#allocation2] sm:$0xff]  ;;  %v24_v1 = vld [vmem:[#allocation2 + $0x8] sm:$0xff]  ;;  %s35_s15 = int_to_ptr.hbm [resolvable:$true] %s34_s15 }
   0x6   :  { %s32_s12 = sshll.u32 %s99_s11, 4  ;;  %25 = vst [vmem:[#allocation5] sm:$0xff] %v23_v0  ;;  %s33_s12 = int_to_ptr.vmem [resolvable:$true] %s32_s12 }
   0x7   :  { %26 = vst [vmem:[#allocation5 + $0x8] sm:$0xff] %v24_v1 }
   0x8   :  { %37 = dma.vmem_to_hbm [thread:$0]  %s33_s12, 256, %s35_s15, [#allocation4]  }
   0x9   :  { %96 = dma.done.wait [#allocation4], 256  }
   0xa   :  { %97 = vsyncadd [#allocation4], 4294967040 }
   0xb   :  { %42 = vsyncpa [#allocation3], 1 }
   0xc   :  { %43 = vsyncpa [#allocation4], 1 }

</bundles_post_ra>
